<compile_context>
chip_gen: v7x
topology: tpu7x:2x2x1
jax: 0.10.0
libtpu: 0.0.40
codegen_flags: <defaults>
</compile_context>

<pallas_src>
import functools

import jax
import jax.numpy as jnp
import numpy as np
from jax.experimental import pallas as pl
from jax.experimental.pallas import tpu as pltpu


def _round_up(x, m):
    return (x + m - 1) // m * m


def residual_block_kernel(x_ref, w_ref, scale_ref, shift_ref, sb_ref, o_ref,
                          *, K, Wp):
    """Fused conv3x3 + BN + ReLU and 1x1-skip + add + ReLU for one batch elem.

    x_ref:     (1, Cin, Lpad)       bf16  padded image, row-major flattened
    w_ref:     (K*K, 2*Cout, Cin)   bf16  per-tap [conv | skip] weights
    scale_ref: (Cout, 1)            f32   BN scale gamma/sqrt(var+eps)
    shift_ref: (Cout, 1)            f32   (conv_b - mean)*scale + beta
    sb_ref:    (Cout, 1)            f32   skip-conv bias
    o_ref:     (1, Cout, L)         out   extended-width output (cropped later)
    """
    Cout = scale_ref.shape[0]
    L = o_ref.shape[-1]
    acc = jnp.zeros((2 * Cout, L), jnp.float32)
    # In-kernel im2col: each tap is a static contiguous lane slice of the
    # flattened padded image; accumulate K*K small matmuls into fp32.
    for kh in range(K):
        for kw in range(K):
            t = kh * K + kw
            off = kh * Wp + kw
            x_tap = x_ref[0, :, off:off + L]                     # (Cin, L)
            acc = acc + jnp.dot(w_ref[t], x_tap,
                                preferred_element_type=jnp.float32)
    # conv + bias + BN (fp32) + ReLU
    y = jnp.maximum(acc[:Cout] * scale_ref[...] + shift_ref[...], 0.0)
    # TODO(synk): nn.Dropout2d is identity here (eval mode); training-mode
    # channel dropout (p>0, 1/(1-p) scaling) is not implemented.
    res = acc[Cout:] + sb_ref[...]                               # 1x1 skip conv
    o_ref[0] = jnp.maximum(y + res, 0.0).astype(o_ref.dtype)     # add + ReLU


def prepare_residual_block_params(params, *, kernel_size=3, eps=1e-5,
                                  mxu_dtype=jnp.bfloat16):
    """One-time weight-side preparation (hoisted out of the per-call path)."""
    conv_w, conv_b, gamma, beta, rmean, rvar, skip_w, skip_b = params
    K = kernel_size
    Cout, Cin = conv_w.shape[0], conv_w.shape[1]
    pad = K // 2

    # Tap-major combined weights: (K*K, 2*Cout, Cin); skip lives in the
    # centre tap's lower Cout rows (centre tap == the unpadded pixel itself).
    w_conv = jnp.transpose(conv_w, (2, 3, 0, 1)).reshape(K * K, Cout, Cin)
    w_taps = jnp.zeros((K * K, 2 * Cout, Cin), jnp.float32)
    w_taps = w_taps.at[:, :Cout, :].set(w_conv)
    center = pad * K + pad
    if skip_w is None:
        assert Cin == Cout, "identity skip requires in_channels == out_channels"
        sw = jnp.eye(Cout, dtype=jnp.float32)
        sb = jnp.zeros((Cout,), jnp.float32)
    else:
        sw = skip_w[:, :, 0, 0]                                  # (Cout, Cin)
        sb = skip_b
    w_taps = w_taps.at[center, Cout:, :].set(sw)

    # BN kept as fp32 post-matmul scale/shift (conv bias folded into shift).
    scale = gamma / jnp.sqrt(rvar + eps)
    shift = (conv_b - rmean) * scale + beta
    return (w_taps.astype(mxu_dtype),
            scale.reshape(Cout, 1).astype(jnp.float32),
            shift.reshape(Cout, 1).astype(jnp.float32),
            sb.reshape(Cout, 1).astype(jnp.float32))


def residual_block_apply(x_nchw, prepared, *, mxu_dtype=jnp.bfloat16,
                         out_dtype=None, training=False):
    assert not training, "kernel implements eval-mode forward (Dropout2d = id)"
    w_taps, scale, shift, sb = prepared
    KK, Cout2, Cin_w = w_taps.shape
    K = int(round(KK ** 0.5))
    assert K * K == KK and K % 2 == 1
    Cout = Cout2 // 2
    B, Cin, H, W = x_nchw.shape
    assert Cin == Cin_w
    pad = K // 2
    Hp, Wp = H + 2 * pad, W + 2 * pad
    out_dtype = out_dtype or x_nchw.dtype

    # Extended output width: compute over (H, Wp) row-major (columns >= W are
    # harmless garbage), padded up to a 128-lane multiple -> unmasked stores.
    L = _round_up(H * Wp, 128)
    halo = (K - 1) * Wp + (K - 1)            # largest static tap offset
    Lpad = _round_up(halo + L, 128)

    # Per-forward activation prep only: pad + flatten + cast (1x activation
    # bytes; no host-side 9x im2col).
    xflat = jnp.pad(x_nchw, ((0, 0), (0, 0), (pad, pad), (pad, pad)))
    xflat = xflat.reshape(B, Cin, Hp * Wp)
    xflat = jnp.pad(xflat, ((0, 0), (0, 0), (0, Lpad - Hp * Wp)))
    xflat = xflat.astype(mxu_dtype)

    flops = 2 * (2 * Cout) * Cin * (K * K) * B * L
    bytes_accessed = int(B * Cin * Lpad * jnp.dtype(mxu_dtype).itemsize
                         + w_taps.size * jnp.dtype(mxu_dtype).itemsize
                         + 3 * Cout * 4
                         + B * Cout * L * jnp.dtype(out_dtype).itemsize)

    kernel = functools.partial(residual_block_kernel, K=K, Wp=Wp)

    # TODO(synk): at production H*W add a spatial row-tile grid axis (halo'd
    # blocks / manual DMA) so the per-step working set fits v7x's 64 MiB VMEM.
    out_ext = pl.pallas_call(
        kernel,
        out_shape=jax.ShapeDtypeStruct((B, Cout, L), out_dtype),
        grid_spec=pltpu.PrefetchScalarGridSpec(
            num_scalar_prefetch=0,
            grid=(B,),
            in_specs=[
                pl.BlockSpec((1, Cin, Lpad), lambda b: (b, 0, 0)),
                pl.BlockSpec((KK, 2 * Cout, Cin), lambda b: (0, 0, 0)),
                pl.BlockSpec((Cout, 1), lambda b: (0, 0)),
                pl.BlockSpec((Cout, 1), lambda b: (0, 0)),
                pl.BlockSpec((Cout, 1), lambda b: (0, 0)),
            ],
            out_specs=pl.BlockSpec((1, Cout, L), lambda b: (b, 0, 0)),
        ),
        compiler_params=pltpu.CompilerParams(
            dimension_semantics=("parallel",)),
        cost_estimate=pl.CostEstimate(flops=flops, transcendentals=0,
                                      bytes_accessed=bytes_accessed),
    )(xflat, w_taps, scale, shift, sb)

    # Crop extended width back to the valid H x W window (cheap XLA slice).
    out = out_ext[:, :, :H * Wp].reshape(B, Cout, H, Wp)[:, :, :, :W]
    return out


def reference(x, params, eps=1e-5):
    """Pure-JAX reference matching the PyTorch forward (eval mode)."""
    conv_w, conv_b, gamma, beta, rmean, rvar, skip_w, skip_b = params
    dn = ('NCHW', 'OIHW', 'NCHW')
    conv = jax.lax.conv_general_dilated(
        x, conv_w, (1, 1), ((1, 1), (1, 1)),
        dimension_numbers=dn) + conv_b[None, :, None, None]
    bn = ((conv - rmean[None, :, None, None])
          / jnp.sqrt(rvar + eps)[None, :, None, None]
          * gamma[None, :, None, None] + beta[None, :, None, None])
    y = jnp.maximum(bn, 0.0)
    skip = jax.lax.conv_general_dilated(
        x, skip_w, (1, 1), ((0, 0), (0, 0)),
        dimension_numbers=dn) + skip_b[None, :, None, None]
    return jnp.maximum(y + skip, 0.0)


if __name__ == "__main__":
    B, Cin, Cout, H, W, K = 2, 8, 16, 16, 16, 3

    key = jax.random.PRNGKey(0)
    ks = jax.random.split(key, 9)
    conv_w = jax.random.normal(ks[0], (Cout, Cin, K, K), jnp.float32) * 0.1
    conv_b = jax.random.normal(ks[1], (Cout,), jnp.float32) * 0.1
    gamma  = 1.0 + 0.1 * jax.random.normal(ks[2], (Cout,), jnp.float32)
    beta   = 0.1 * jax.random.normal(ks[3], (Cout,), jnp.float32)
    rmean  = 0.1 * jax.random.normal(ks[4], (Cout,), jnp.float32)
    rvar   = 0.5 + jax.random.uniform(ks[5], (Cout,), jnp.float32)
    skip_w = jax.random.normal(ks[6], (Cout, Cin, 1, 1), jnp.float32) * 0.1
    skip_b = jax.random.normal(ks[7], (Cout,), jnp.float32) * 0.1
    params = (conv_w, conv_b, gamma, beta, rmean, rvar, skip_w, skip_b)

    x = jax.random.normal(ks[8], (B, Cin, H, W), jnp.float32)

    # One-time weight preparation (hoisted out of the forward path).
    prepared = jax.block_until_ready(
        prepare_residual_block_params(params, kernel_size=K))

    out = jax.block_until_ready(residual_block_apply(x, prepared))
    ref = jax.block_until_ready(reference(x, params))

    # bf16 MXU operands with fp32 accumulation / fp32 BN epilogue -> relaxed
    # (but tight for bf16) comparison against the pure-fp32 reference.
    np.testing.assert_allclose(np.asarray(out), np.asarray(ref),
                               rtol=1e-2, atol=2e-2)
    print("KERNEL_OK")
</pallas_src>

<mosaic_0001>
module attributes {stable_mosaic.version = 11 : i64} {
  func.func @residual_block_kernel(%arg0: i32, %arg1: memref<1x8x512xbf16, #tpu.memory_space<vmem>>, %arg2: memref<9x32x8xbf16, #tpu.memory_space<vmem>>, %arg3: memref<16x1xf32, #tpu.memory_space<vmem>>, %arg4: memref<16x1xf32, #tpu.memory_space<vmem>>, %arg5: memref<16x1xf32, #tpu.memory_space<vmem>>, %arg6: memref<1x16x384xf32, #tpu.memory_space<vmem>>) attributes {dimension_semantics = [#tpu.dimension_semantics<parallel>], iteration_bounds = array<i64: 2>, scalar_prefetch = 0 : i64, scratch_operands = 0 : i64, tpu.core_type = #tpu.core_type<tc>, window_params = [{transform_indices = @transform_0, window_bounds = array<i64: 1, 8, 512>}, {pipeline_mode = #tpu.pipeline_mode<synchronous>, transform_indices = @transform_1, window_bounds = array<i64: 9, 32, 8>}, {pipeline_mode = #tpu.pipeline_mode<synchronous>, transform_indices = @transform_2, window_bounds = array<i64: 16, 1>}, {pipeline_mode = #tpu.pipeline_mode<synchronous>, transform_indices = @transform_3, window_bounds = array<i64: 16, 1>}, {pipeline_mode = #tpu.pipeline_mode<synchronous>, transform_indices = @transform_4, window_bounds = array<i64: 16, 1>}, {transform_indices = @transform_5, window_bounds = array<i64: 1, 16, 384>}]} {
    %cst = arith.constant 0.000000e+00 : f32
    %0 = vector.broadcast %cst : f32 to vector<32x384xf32>
    %c0 = arith.constant 0 : index
    %c0_0 = arith.constant 0 : index
    %c0_1 = arith.constant 0 : index
    %1 = vector.load %arg1[%c0, %c0_0, %c0_1] : memref<1x8x512xbf16, #tpu.memory_space<vmem>>, vector<1x8x384xbf16>
    %2 = vector.shape_cast %1 : vector<1x8x384xbf16> to vector<8x384xbf16>
    %c0_2 = arith.constant 0 : index
    %c0_3 = arith.constant 0 : index
    %c0_4 = arith.constant 0 : index
    %3 = vector.load %arg2[%c0_2, %c0_3, %c0_4] : memref<9x32x8xbf16, #tpu.memory_space<vmem>>, vector<1x32x8xbf16>
    %4 = vector.shape_cast %3 : vector<1x32x8xbf16> to vector<32x8xbf16>
    %cst_5 = arith.constant dense<0.000000e+00> : vector<32x384xf32>
    %5 = tpu.matmul %4, %2, %cst_5 {dimension_numbers = #tpu.dot_dimension_numbers<[1], [0], [0], [1], [0, 0, 1, 1], [], []>} : vector<32x8xbf16>, vector<8x384xbf16>, vector<32x384xf32> -> vector<32x384xf32>
    %6 = arith.addf %0, %5 : vector<32x384xf32>
    %c0_6 = arith.constant 0 : index
    %c0_7 = arith.constant 0 : index
    %c1 = arith.constant 1 : index
    %7 = vector.load %arg1[%c0_6, %c0_7, %c1] : memref<1x8x512xbf16, #tpu.memory_space<vmem>>, vector<1x8x384xbf16>
    %8 = vector.shape_cast %7 : vector<1x8x384xbf16> to vector<8x384xbf16>
    %c1_8 = arith.constant 1 : index
    %c0_9 = arith.constant 0 : index
    %c0_10 = arith.constant 0 : index
    %9 = vector.load %arg2[%c1_8, %c0_9, %c0_10] : memref<9x32x8xbf16, #tpu.memory_space<vmem>>, vector<1x32x8xbf16>
    %10 = vector.shape_cast %9 : vector<1x32x8xbf16> to vector<32x8xbf16>
    %cst_11 = arith.constant dense<0.000000e+00> : vector<32x384xf32>
    %11 = tpu.matmul %10, %8, %cst_11 {dimension_numbers = #tpu.dot_dimension_numbers<[1], [0], [0], [1], [0, 0, 1, 1], [], []>} : vector<32x8xbf16>, vector<8x384xbf16>, vector<32x384xf32> -> vector<32x384xf32>
    %12 = arith.addf %6, %11 : vector<32x384xf32>
    %c0_12 = arith.constant 0 : index
    %c0_13 = arith.constant 0 : index
    %c2 = arith.constant 2 : index
    %13 = vector.load %arg1[%c0_12, %c0_13, %c2] : memref<1x8x512xbf16, #tpu.memory_space<vmem>>, vector<1x8x384xbf16>
    %14 = vector.shape_cast %13 : vector<1x8x384xbf16> to vector<8x384xbf16>
    %c2_14 = arith.constant 2 : index
    %c0_15 = arith.constant 0 : index
    %c0_16 = arith.constant 0 : index
    %15 = vector.load %arg2[%c2_14, %c0_15, %c0_16] : memref<9x32x8xbf16, #tpu.memory_space<vmem>>, vector<1x32x8xbf16>
    %16 = vector.shape_cast %15 : vector<1x32x8xbf16> to vector<32x8xbf16>
    %cst_17 = arith.constant dense<0.000000e+00> : vector<32x384xf32>
    %17 = tpu.matmul %16, %14, %cst_17 {dimension_numbers = #tpu.dot_dimension_numbers<[1], [0], [0], [1], [0, 0, 1, 1], [], []>} : vector<32x8xbf16>, vector<8x384xbf16>, vector<32x384xf32> -> vector<32x384xf32>
    %18 = arith.addf %12, %17 : vector<32x384xf32>
    %c0_18 = arith.constant 0 : index
    %c0_19 = arith.constant 0 : index
    %c18 = arith.constant 18 : index
    %19 = vector.load %arg1[%c0_18, %c0_19, %c18] : memref<1x8x512xbf16, #tpu.memory_space<vmem>>, vector<1x8x384xbf16>
    %20 = vector.shape_cast %19 : vector<1x8x384xbf16> to vector<8x384xbf16>
    %c3 = arith.constant 3 : index
    %c0_20 = arith.constant 0 : index
    %c0_21 = arith.constant 0 : index
    %21 = vector.load %arg2[%c3, %c0_20, %c0_21] : memref<9x32x8xbf16, #tpu.memory_space<vmem>>, vector<1x32x8xbf16>
    %22 = vector.shape_cast %21 : vector<1x32x8xbf16> to vector<32x8xbf16>
    %cst_22 = arith.constant dense<0.000000e+00> : vector<32x384xf32>
    %23 = tpu.matmul %22, %20, %cst_22 {dimension_numbers = #tpu.dot_dimension_numbers<[1], [0], [0], [1], [0, 0, 1, 1], [], []>} : vector<32x8xbf16>, vector<8x384xbf16>, vector<32x384xf32> -> vector<32x384xf32>
    %24 = arith.addf %18, %23 : vector<32x384xf32>
    %c0_23 = arith.constant 0 : index
    %c0_24 = arith.constant 0 : index
    %c19 = arith.constant 19 : index
    %25 = vector.load %arg1[%c0_23, %c0_24, %c19] : memref<1x8x512xbf16, #tpu.memory_space<vmem>>, vector<1x8x384xbf16>
    %26 = vector.shape_cast %25 : vector<1x8x384xbf16> to vector<8x384xbf16>
    %c4 = arith.constant 4 : index
    %c0_25 = arith.constant 0 : index
    %c0_26 = arith.constant 0 : index
    %27 = vector.load %arg2[%c4, %c0_25, %c0_26] : memref<9x32x8xbf16, #tpu.memory_space<vmem>>, vector<1x32x8xbf16>
    %28 = vector.shape_cast %27 : vector<1x32x8xbf16> to vector<32x8xbf16>
    %cst_27 = arith.constant dense<0.000000e+00> : vector<32x384xf32>
    %29 = tpu.matmul %28, %26, %cst_27 {dimension_numbers = #tpu.dot_dimension_numbers<[1], [0], [0], [1], [0, 0, 1, 1], [], []>} : vector<32x8xbf16>, vector<8x384xbf16>, vector<32x384xf32> -> vector<32x384xf32>
    %30 = arith.addf %24, %29 : vector<32x384xf32>
    %c0_28 = arith.constant 0 : index
    %c0_29 = arith.constant 0 : index
    %c20 = arith.constant 20 : index
    %31 = vector.load %arg1[%c0_28, %c0_29, %c20] : memref<1x8x512xbf16, #tpu.memory_space<vmem>>, vector<1x8x384xbf16>
    %32 = vector.shape_cast %31 : vector<1x8x384xbf16> to vector<8x384xbf16>
    %c5 = arith.constant 5 : index
    %c0_30 = arith.constant 0 : index
    %c0_31 = arith.constant 0 : index
    %33 = vector.load %arg2[%c5, %c0_30, %c0_31] : memref<9x32x8xbf16, #tpu.memory_space<vmem>>, vector<1x32x8xbf16>
    %34 = vector.shape_cast %33 : vector<1x32x8xbf16> to vector<32x8xbf16>
    %cst_32 = arith.constant dense<0.000000e+00> : vector<32x384xf32>
    %35 = tpu.matmul %34, %32, %cst_32 {dimension_numbers = #tpu.dot_dimension_numbers<[1], [0], [0], [1], [0, 0, 1, 1], [], []>} : vector<32x8xbf16>, vector<8x384xbf16>, vector<32x384xf32> -> vector<32x384xf32>
    %36 = arith.addf %30, %35 : vector<32x384xf32>
    %c0_33 = arith.constant 0 : index
    %c0_34 = arith.constant 0 : index
    %c36 = arith.constant 36 : index
    %37 = vector.load %arg1[%c0_33, %c0_34, %c36] : memref<1x8x512xbf16, #tpu.memory_space<vmem>>, vector<1x8x384xbf16>
    %38 = vector.shape_cast %37 : vector<1x8x384xbf16> to vector<8x384xbf16>
    %c6 = arith.constant 6 : index
    %c0_35 = arith.constant 0 : index
    %c0_36 = arith.constant 0 : index
    %39 = vector.load %arg2[%c6, %c0_35, %c0_36] : memref<9x32x8xbf16, #tpu.memory_space<vmem>>, vector<1x32x8xbf16>
    %40 = vector.shape_cast %39 : vector<1x32x8xbf16> to vector<32x8xbf16>
    %cst_37 = arith.constant dense<0.000000e+00> : vector<32x384xf32>
    %41 = tpu.matmul %40, %38, %cst_37 {dimension_numbers = #tpu.dot_dimension_numbers<[1], [0], [0], [1], [0, 0, 1, 1], [], []>} : vector<32x8xbf16>, vector<8x384xbf16>, vector<32x384xf32> -> vector<32x384xf32>
    %42 = arith.addf %36, %41 : vector<32x384xf32>
    %c0_38 = arith.constant 0 : index
    %c0_39 = arith.constant 0 : index
    %c37 = arith.constant 37 : index
    %43 = vector.load %arg1[%c0_38, %c0_39, %c37] : memref<1x8x512xbf16, #tpu.memory_space<vmem>>, vector<1x8x384xbf16>
    %44 = vector.shape_cast %43 : vector<1x8x384xbf16> to vector<8x384xbf16>
    %c7 = arith.constant 7 : index
    %c0_40 = arith.constant 0 : index
    %c0_41 = arith.constant 0 : index
    %45 = vector.load %arg2[%c7, %c0_40, %c0_41] : memref<9x32x8xbf16, #tpu.memory_space<vmem>>, vector<1x32x8xbf16>
    %46 = vector.shape_cast %45 : vector<1x32x8xbf16> to vector<32x8xbf16>
    %cst_42 = arith.constant dense<0.000000e+00> : vector<32x384xf32>
    %47 = tpu.matmul %46, %44, %cst_42 {dimension_numbers = #tpu.dot_dimension_numbers<[1], [0], [0], [1], [0, 0, 1, 1], [], []>} : vector<32x8xbf16>, vector<8x384xbf16>, vector<32x384xf32> -> vector<32x384xf32>
    %48 = arith.addf %42, %47 : vector<32x384xf32>
    %c0_43 = arith.constant 0 : index
    %c0_44 = arith.constant 0 : index
    %c38 = arith.constant 38 : index
    %49 = vector.load %arg1[%c0_43, %c0_44, %c38] : memref<1x8x512xbf16, #tpu.memory_space<vmem>>, vector<1x8x384xbf16>
    %50 = vector.shape_cast %49 : vector<1x8x384xbf16> to vector<8x384xbf16>
    %c8 = arith.constant 8 : index
    %c0_45 = arith.constant 0 : index
    %c0_46 = arith.constant 0 : index
    %51 = vector.load %arg2[%c8, %c0_45, %c0_46] : memref<9x32x8xbf16, #tpu.memory_space<vmem>>, vector<1x32x8xbf16>
    %52 = vector.shape_cast %51 : vector<1x32x8xbf16> to vector<32x8xbf16>
    %cst_47 = arith.constant dense<0.000000e+00> : vector<32x384xf32>
    %53 = tpu.matmul %52, %50, %cst_47 {dimension_numbers = #tpu.dot_dimension_numbers<[1], [0], [0], [1], [0, 0, 1, 1], [], []>} : vector<32x8xbf16>, vector<8x384xbf16>, vector<32x384xf32> -> vector<32x384xf32>
    %54 = arith.addf %48, %53 : vector<32x384xf32>
    %55 = vector.extract_strided_slice %54 {offsets = [0, 0], sizes = [16, 384], strides = [1, 1]} : vector<32x384xf32> to vector<16x384xf32>
    %c0_48 = arith.constant 0 : index
    %c0_49 = arith.constant 0 : index
    %56 = vector.load %arg3[%c0_48, %c0_49] : memref<16x1xf32, #tpu.memory_space<vmem>>, vector<16x1xf32>
    %57 = vector.broadcast %56 : vector<16x1xf32> to vector<16x384xf32>
    %58 = arith.mulf %55, %57 : vector<16x384xf32>
    %c0_50 = arith.constant 0 : index
    %c0_51 = arith.constant 0 : index
    %59 = vector.load %arg4[%c0_50, %c0_51] : memref<16x1xf32, #tpu.memory_space<vmem>>, vector<16x1xf32>
    %60 = vector.broadcast %59 : vector<16x1xf32> to vector<16x384xf32>
    %61 = arith.addf %58, %60 : vector<16x384xf32>
    %cst_52 = arith.constant 0.000000e+00 : f32
    %62 = vector.broadcast %cst_52 : f32 to vector<16x384xf32>
    %63 = arith.maximumf %61, %62 : vector<16x384xf32>
    %64 = vector.extract_strided_slice %54 {offsets = [16, 0], sizes = [16, 384], strides = [1, 1]} : vector<32x384xf32> to vector<16x384xf32>
    %c0_53 = arith.constant 0 : index
    %c0_54 = arith.constant 0 : index
    %65 = vector.load %arg5[%c0_53, %c0_54] : memref<16x1xf32, #tpu.memory_space<vmem>>, vector<16x1xf32>
    %66 = vector.broadcast %65 : vector<16x1xf32> to vector<16x384xf32>
    %67 = arith.addf %64, %66 : vector<16x384xf32>
    %68 = arith.addf %63, %67 : vector<16x384xf32>
    %cst_55 = arith.constant 0.000000e+00 : f32
    %69 = vector.broadcast %cst_55 : f32 to vector<16x384xf32>
    %70 = arith.maximumf %68, %69 : vector<16x384xf32>
    %c0_56 = arith.constant 0 : index
    %c0_57 = arith.constant 0 : index
    %c0_58 = arith.constant 0 : index
    %71 = vector.load %arg6[%c0_56, %c0_57, %c0_58] : memref<1x16x384xf32, #tpu.memory_space<vmem>>, vector<1x16x384xf32>
    %72 = vector.shape_cast %71 : vector<1x16x384xf32> to vector<16x384xf32>
    %73 = vector.shape_cast %70 : vector<16x384xf32> to vector<1x16x384xf32>
    tpu.vector_store %arg6[%c0_56, %c0_57, %c0_58], %73 {strides = array<i32>} : memref<1x16x384xf32, #tpu.memory_space<vmem>>, vector<1x16x384xf32>,
    return
  }
  func.func @transform_0(%arg0: i32) -> (i32, i32, i32) {
    %c0_i32 = arith.constant 0 : i32
    %c0_i32_0 = arith.constant 0 : i32
    %c0_i32_1 = arith.constant 0 : i32
    return %arg0, %c0_i32, %c0_i32_0 : i32, i32, i32
  }
  func.func @transform_1(%arg0: i32) -> (i32, i32, i32) {
    %c0_i32 = arith.constant 0 : i32
    %c0_i32_0 = arith.constant 0 : i32
    %c0_i32_1 = arith.constant 0 : i32
    %c0_i32_2 = arith.constant 0 : i32
    return %c0_i32, %c0_i32_0, %c0_i32_1 : i32, i32, i32
  }
  func.func @transform_2(%arg0: i32) -> (i32, i32) {
    %c0_i32 = arith.constant 0 : i32
    %c0_i32_0 = arith.constant 0 : i32
    %c0_i32_1 = arith.constant 0 : i32
    return %c0_i32, %c0_i32_0 : i32, i32
  }
  func.func @transform_3(%arg0: i32) -> (i32, i32) {
    %c0_i32 = arith.constant 0 : i32
    %c0_i32_0 = arith.constant 0 : i32
    %c0_i32_1 = arith.constant 0 : i32
    return %c0_i32, %c0_i32_0 : i32, i32
  }
  func.func @transform_4(%arg0: i32) -> (i32, i32) {
    %c0_i32 = arith.constant 0 : i32
    %c0_i32_0 = arith.constant 0 : i32
    %c0_i32_1 = arith.constant 0 : i32
    return %c0_i32, %c0_i32_0 : i32, i32
  }
  func.func @transform_5(%arg0: i32) -> (i32, i32, i32) {
    %c0_i32 = arith.constant 0 : i32
    %c0_i32_0 = arith.constant 0 : i32
    %c0_i32_1 = arith.constant 0 : i32
    return %arg0, %c0_i32, %c0_i32_0 : i32, i32, i32
  }
}

</mosaic_0001>

<bundles_post_ra>
// kernel: tpu_custom_call.1
= control target key start
LH: loop header
LB: loop body
LE: loop exit
PB: predicated region body
PF: predicated region fallthrough
CT: control target
= control target key end

     0   :  { %10 = vsyncpa [#allocation3], 0  ;;  %s2589_s0 = inlined_call_operand.vmem [shape: bf16[2,8,512], index: 0, kind: input, shape index: {}]   ;;  %s2590_s1 = inlined_call_operand.vmem [shape: bf16[9,32,8], index: 1, kind: input, shape index: {}]   ;;  %s2591_s2 = inlined_call_operand.vmem [shape: f32[16,1], index: 2, kind: input, shape index: {}]   ;;  %s2592_s3 = inlined_call_operand.vmem [shape: f32[16,1], index: 3, kind: input, shape index: {}]   ;;  %s2593_s4 = inlined_call_operand.vmem [shape: f32[16,1], index: 4, kind: input, shape index: {}]   ;;  %s2594_s5 = inlined_call_operand.hbm [shape: f32[2,16,384], index: 5, kind: output, shape index: {}]  }
   0x1   :  { %12 = vsyncpa [#allocation3 + $0x1], 0  ;;  %s2250_s18 = smov 0   ;;  %s2252_s19 = smov 0  }
   0x2   :  { %s2254_s20 = smov 0   ;;  %s2256_s21 = smov 0  }
   0x3 LB: > { %s2271_s22 = sadd.s32 4294967295, %s2206_s21   ;;  %s1769_s23 = sadd.s32 4294967294, %s2206_s21   ;;  %s2206_s21 = sphi %s2256_s21, %s2600_s21   ;;  %s2202_s20 = sphi %s2254_s20, %s2599_s20   ;;  %s2198_s19 = sphi %s2252_s19, %s2598_s19   ;;  %s2194_s18 = sphi %s2250_s18, %s2597_s18  }
   0x4   : > { %s2275_s24 = sadd.s32 1, %s2206_s21   ;;  %s135_s25 = sadd.s32 1, %s2202_s20 }
   0x5   : > { %s132_s26 = ssub.s32 %s2206_s21, %s2275_s24  ;;  %p145_p0 = scmp.ne.s32.totalorder %s2202_s20, %s2198_s19 }
   0x6   : > { %p133_p1 = scmp.eq.s32.totalorder %s132_s26, 0  ;;  %p146_p2 = scmp.eq.s32.totalorder %s2271_s22, 1 }
   0x7   : > { %p151_p3 = scmp.ne.s32.totalorder %s2198_s19, %s2194_s18  ;;  %p152_p4 = scmp.eq.s32.totalorder %s1769_s23, 1 }
   0x8   : > { %s2286_s27 = scalar_select %p133_p1, %s2202_s20, %s135_s25  }
   0x9   : > { %p2288_p5 = por %p146_p2, %p145_p0  ;;  %p2292_p6 = por %p152_p4, %p151_p3 }
   0xa   : > { %p1772_p7 = scmp.ge.s32.totalorder %s2206_s21, 1  ;;  %p190_p8 = scmp.lt.s32.totalorder %s2206_s21, 3 }
   0xc   : > { %p191_p9 = pnand %p1772_p7, %p190_p8 }
   0xd   : > { %p218_p10 = scmp.lt.s32.totalorder (!%p191_p9), %s2271_s22, 1  ;;  %v2208_v0 = vmov (!%p191_p9), 0   ;;  %s2209_s10 = smov (!%p191_p9), 127   ;;  %vm265_vm0 = vcmask (!%p191_p9), 1039360   ;;  %vm276_vm1 = vcmask (!%p191_p9), 1043456   ;;  %v2125_v14 = vld [vmem:[%s2590_s1 + $0x10] sm:$0xff] (!%p191_p9)  }
   0xe   : > { %194 = sbr.rel (%p191_p9) target bundleno = 516 (0x204), region = 40  ;;  %318 = vmatprep.mubr.bf16.mxu1 (!%p191_p9), %v2208_v0  ;;  %597 = vmatprep.mubr.bf16.mxu0 (!%p191_p9), %v2208_v0  ;;  %s2210_s11 = smov (!%p191_p9), 126   ;;  %vm546_vm2 = vcmask (!%p191_p9), 1031168   ;;  %v1616_v15 = vld [vmem:[%s2591_s2 + $0x8] sm:$0xff] (!%p191_p9)  ;;  %v1615_v16 = vld [vmem:[%s2591_s2] sm:$0xff] (!%p191_p9)  ;;  %vm269_vm3 = vcmask (!%p191_p9), 64512  }
   0xf   : > { %2120 = vset.pattern.permute.xlu1 (!%p191_p9), %v2208_v0  ;;  %2119 = vset.pattern.permute.xlu0 (!%p191_p9), %v2208_v0  ;;  %s2211_s12 = smov (!%p191_p9), 110   ;;  %s2212_s13 = smov (!%p191_p9), 109   ;;  %v1633_v21 = vld [vmem:[%s2592_s3] sm:$0xff] (!%p191_p9)  ;;  %v1634_v23 = vld [vmem:[%s2592_s3 + $0x8] sm:$0xff] (!%p191_p9)  ;;  %v2126_v29 = vld [vmem:[%s2590_s1 + $0x18] sm:$0xff] (!%p191_p9)   ;;  %vm702_vm4 = vcmask (!%p191_p9), 900096  }
  0x10   : > { %s2213_s14 = smov (!%p191_p9), 108   ;;  %s2214_s15 = smov (!%p191_p9), 92   ;;  %v1657_v28 = vld [vmem:[%s2593_s4] sm:$0xff] (!%p191_p9)  ;;  %v1658_v31 = vld [vmem:[%s2593_s4 + $0x8] sm:$0xff] (!%p191_p9)  ;;  %vm858_vm5 = vcmask (!%p191_p9), 891904   ;;  %v2131_v48 = vld [vmem:[%s2590_s1 + $0x30] sm:$0xff] (!%p191_p9)  }
  0x11   : > { %s2215_s16 = smov (!%p191_p9), 91   ;;  %s2216_s17 = smov (!%p191_p9), 90   ;;  %v2367_v30 = vld [vmem:[%s2590_s1 + $0x20] sm:$0xff] (!%p191_p9)   ;;  %v2387_v39 = vld [vmem:[%s2590_s1 + $0x28] sm:$0xff] (!%p191_p9)   ;;  %vm1014_vm6 = vcmask (!%p191_p9), 883712   ;;  %v2132_v56 = vld [vmem:[%s2590_s1 + $0x38] sm:$0xff] (!%p191_p9)  }
  0x12   : > { %v2130_v47 = vld [vmem:[%s2590_s1] sm:$0xff] (!%p191_p9)   ;;  %v2133_v57 = vld [vmem:[%s2590_s1 + $0x8] sm:$0xff] (!%p191_p9)   ;;  %vm1170_vm7 = vcmask (!%p191_p9), 752640   ;;  %vm1326_vm8 = vcmask (!%p191_p9), 744448   ;;  %vm1482_vm9 = vcmask (!%p191_p9), 736256   ;;  %s215_s25 = sand.u32 (!%p191_p9), 1, %s2198_s19  }
  0x13   : > { %v2134_v60 = vld [vmem:[%s2590_s1 + $0x40] sm:$0xff] (!%p191_p9)   ;;  %s2067_s26 = smul.u32 (!%p191_p9), 48, %s215_s25 }
  0x15   : > { %s219_s30 = scalar_select %p218_p10, %s2271_s22, 1 }
  0x17   : > { %s1880_s6 = sshll.u32 %s219_s30, 4  ;;  %s217_s30 = scalar_lea.vmem [#allocation2], %s2067_s26 }
  0x18   : > { %s2305_s9 = scalar_lea.vmem %s2589_s0, %s1880_s6  ;;  %s2068_s6 = smul.u32 768, %s2271_s22 }
  0x19   : > { %v231_v1 = vld [vmem:[%s2305_s9 + $0x8] sm:$0xff]  ;;  %v230_v2 = vld [vmem:[%s2305_s9] sm:$0xff]  ;;  %s2548_s22 = scalar_lea.sflag [#allocation3], %s215_s25 }
  0x1a   : > { %v1783_v3 = vcombine.low %v231_v1, %v231_v1  ;;  %v2311_v4 = vcombine.low %v230_v2, %v230_v2  ;;  %v1784_v5 = vcombine.high %v231_v1, %v231_v1  ;;  %v2314_v6 = vcombine.high %v230_v2, %v230_v2  ;;  %v2129_v42 = vld [vmem:[%s2305_s9 + $0x8] ss:$0 sps:$4 sm:$0xff]   ;;  %s1707_s9 = sshll.u32 %s217_s30, 4  ;;  %s2544_s9 = int_to_ptr.vmem [resolvable:$true] %s1707_s9 }
  0x1b   : > { %v419_v50 = vsel %vm276_vm1, %v2129_v42, 0 }
  0x1c   : > { %261 = vrot.lane.b32.xlu1 %v1783_v3, %s2209_s10  ;;  %257 = vrot.lane.b32.xlu0 %v2311_v4, %s2209_s10  ;;  %v413_v41 = vsel %vm276_vm1, %v2311_v4, 0 }
  0x20   : > { %263 = vrot.lane.b32.xlu1 %v1784_v5, %s2209_s10  ;;  %259 = vrot.lane.b32.xlu0 %v2314_v6, %s2209_s10  ;;  %s2542_s10 = scalar_lea.hbm %s2594_s5, %s2068_s6 }
  0x24   : > { %538 = vrot.lane.b32.xlu0 %v2311_v4, %s2210_s11  ;;  %540 = vrot.lane.b32.xlu1 %v2314_v6, %s2210_s11 }
  0x28   : > { %542 = vrot.lane.b32.xlu0 %v1783_v3, %s2210_s11  ;;  %694 = vrot.lane.b32.xlu1 %v2311_v4, %s2211_s12 }
  0x2c   : > { %696 = vrot.lane.b32.xlu0 %v2314_v6, %s2211_s12  ;;  %698 = vrot.lane.b32.xlu1 %v1783_v3, %s2211_s12 }
  0x30   : > { %544 = vrot.lane.b32.xlu0 %v1784_v5, %s2210_s11  ;;  %850 = vrot.lane.b32.xlu1 %v2311_v4, %s2212_s13  ;;  %s2144_s11 = scalar_lea.vmem %s2544_s9, 768 }
  0x31   : > { %p2145_p11 = scmp.ne.s32.totalorder %s2544_s9, %s2144_s11 }
  0x33   : > { %p2146_p12 = pnand %p2145_p11, %p2288_p5 }
  0x34   : > { %852 = vrot.lane.b32.xlu0 %v2314_v6, %s2212_s13  ;;  %854 = vrot.lane.b32.xlu1 %v1783_v3, %s2212_s13 }
  0x35   : > { %p2147_p13 = pneg %p2146_p12 }
  0x38   : > { %700 = vrot.lane.b32.xlu0 %v1784_v5, %s2211_s12  ;;  %1006 = vrot.lane.b32.xlu1 %v2311_v4, %s2213_s14  ;;  %s2217_s12 = smov [#allocation2]  }
  0x3c   : > { %1008 = vrot.lane.b32.xlu0 %v2314_v6, %s2213_s14  ;;  %1010 = vrot.lane.b32.xlu1 %v1783_v3, %s2213_s14 }
  0x40   : > { %856 = vrot.lane.b32.xlu0 %v1784_v5, %s2212_s13  ;;  %1162 = vrot.lane.b32.xlu1 %v2311_v4, %s2214_s15  ;;  %s2148_s13 = sshll.u32 %s2217_s12, 4  ;;  %s2149_s13 = int_to_ptr.vmem [resolvable:$false] %s2148_s13 }
  0x41   : > { %p2151_p0 = scmp.lt.s32.totalorder %s2544_s9, %s2149_s13 }
  0x44   : > { %1164 = vrot.lane.b32.xlu0 %v2314_v6, %s2214_s15  ;;  %1166 = vrot.lane.b32.xlu1 %v1783_v3, %s2214_s15 }
  0x48   : > { %1012 = vrot.lane.b32.xlu0 %v1784_v5, %s2213_s14  ;;  %1168 = vrot.lane.b32.xlu1 %v1784_v5, %s2214_s15  ;;  %s2150_s14 = scalar_lea.vmem %s2149_s13, 1536 }
  0x49   : > { %p2152_p1 = scmp.lt.s32.totalorder %s2150_s14, %s2144_s11 }
  0x4b   : > { %p2153_p2 = por %p2152_p1, %p2151_p0 }
  0x4c   : > { %1318 = vrot.lane.b32.xlu0 %v2311_v4, %s2215_s16  ;;  %1320 = vrot.lane.b32.xlu1 %v2314_v6, %s2215_s16 }
  0x4d   : > { %p2154_p3 = pnand %p2153_p2, %p2147_p13 }
  0x50   : > { %1322 = vrot.lane.b32.xlu0 %v1783_v3, %s2215_s16  ;;  %1324 = vrot.lane.b32.xlu1 %v1784_v5, %s2215_s16 }
  0x54   : > { %1474 = vrot.lane.b32.xlu0 %v2311_v4, %s2216_s17  ;;  %1476 = vrot.lane.b32.xlu1 %v2314_v6, %s2216_s17 }
  0x58   : > { %1478 = vrot.lane.b32.xlu0 %v1783_v3, %s2216_s17  ;;  %1480 = vrot.lane.b32.xlu1 %v1784_v5, %s2216_s17 }
  0x5c   : > { %1624 = vperm.xlu1 %2120, %v1616_v15   ;;  %1619 = vperm.xlu0 %2119, %v1615_v16  }
  0x60   : > { %1637 = vperm.xlu1 %2120, %v1633_v21   ;;  %1642 = vperm.xlu0 %2119, %v1634_v23   ;;  %v2138_v23 = vld [vmem:[%s2590_s1 + $0x60] sm:$0xff]  }
  0x64   : > { %1661 = vperm.xlu1 %2120, %v1657_v28   ;;  %1666 = vperm.xlu0 %2119, %v1658_v31   ;;  %v2140_v31 = vld [vmem:[%s2590_s1 + $0x70] sm:$0xff]  }
  0x8e   : > { %v262_v7 = vpop.permute.xlu1 %261  ;;  %v258_v8 = vpop.permute.xlu0 %257 }
  0x92   : > { %v264_v9 = vpop.permute.xlu1 %263  ;;  %v260_v10 = vpop.permute.xlu0 %259 }
  0x93   : > { %v267_v11 = vsel %vm265_vm0, %v260_v10, %v262_v7  ;;  %v266_v12 = vsel %vm265_vm0, %v258_v8, %v260_v10  ;;  %v268_v17 = vsel %vm265_vm0, %v262_v7, %v264_v9 }
  0x94   : > { %1785 = vmatprep.subr.msk.bf16.mxu1 %vm276_vm1, %v267_v11  ;;  %v278_v13 = vsel %vm276_vm1, %v266_v12, 0  ;;  %v284_v22 = vsel %vm276_vm1, %v268_v17, 0  ;;  %v2136_v11 = vld [vmem:[%s2590_s1 + $0x50] sm:$0xff]  }
  0x95   : > { %287 = vmatpush1.bf16.msra.mxu1 %v278_v13 }
  0x96   : > { %2058 = vmatprep.subr.msk.bf16.mxu1 %vm276_vm1, %v268_v17  ;;  %v539_v18 = vpop.permute.xlu0 %538  ;;  %v541_v19 = vpop.permute.xlu1 %540  ;;  %v2137_v17 = vld [vmem:[%s2590_s1 + $0x58] sm:$0xff]  }
  0x97   : > { %v547_v20 = vsel %vm546_vm2, %v539_v18, %v541_v19 }
  0x98   : > { %1786 = vmatmul.mubr.msk.bf16.vlgmr.msra.gmra.mrb[0].mxu1 %vm269_vm3, %v2125_v14  ;;  %v557_v25 = vsel %vm276_vm1, %v547_v20, 0 }
  0x99   : > { %1909 = vmatpush3.bf16.msra.mxu1 %v284_v22  ;;  %328 = vmatprep.mubr.bf16.mxu1 %v2208_v0 }
  0x9a   : > { %v543_v24 = vpop.permute.xlu0 %542  ;;  %v695_v26 = vpop.permute.xlu1 %694  ;;  %1795 = vmatprep.subr.msk.bf16.mxu1 %vm276_vm1, %v2314_v6  ;;  %v2135_v6 = vld [vmem:[%s2590_s1 + $0x48] sm:$0xff]  }
  0x9b   : > { %v548_v27 = vsel %vm546_vm2, %v541_v19, %v543_v24 }
  0x9c   : > { %1806 = vmatprep.subr.msk.bf16.mxu0 %vm276_vm1, %v548_v27 }
  0x9d   : > { %566 = vmatpush1.bf16.msra.mxu0 %v557_v25 }
  0x9e   : > { %v697_v32 = vpop.permute.xlu0 %696  ;;  %v2372_v33 = vpop.permute.xlu1 %698 }
  0x9f   : > { %v703_v34 = vsel %vm702_vm4, %v695_v26, %v697_v32  ;;  %v704_v35 = vsel %vm702_vm4, %v697_v32, %v2372_v33 }
  0xa0   : > { %1787 = vmatmul.mubr.msk.bf16.gmra.mrb[4].mxu1 %vm269_vm3, %v2126_v29  ;;  %1807 = vmatmul.mubr.msk.bf16.vlgmr.msra.gmra.mrb[0].mxu0 %vm269_vm3, %v2367_v30  ;;  %v713_v36 = vsel %vm276_vm1, %v703_v34, 0 }
  0xa1   : > { %1910 = vmatprep.mubr.msk.bf16.mxu1 %vm269_vm3, %v2125_v14  ;;  %607 = vmatprep.mubr.bf16.mxu0 %v2208_v0 }
  0xa2   : > { %v545_v37 = vpop.permute.xlu0 %544  ;;  %1817 = vmatprep.subr.msk.bf16.mxu0 %vm276_vm1, %v704_v35  ;;  %v851_v38 = vpop.permute.xlu1 %850 }
  0xa3   : > { %722 = vmatpush1.bf16.msra.mxu0 %v713_v36  ;;  %v549_v54 = vsel %vm546_vm2, %v543_v24, %v545_v37  ;;  %v2141_v36 = vld [vmem:[%s2590_s1 + $0x78] sm:$0xff]  }
  0xa4   : > { %v563_v1 = vsel %vm276_vm1, %v549_v54, 0 }
  0xa6   : > { %v853_v40 = vpop.permute.xlu0 %852  ;;  %v2392_v43 = vpop.permute.xlu1 %854 }
  0xa7   : > { %v860_v44 = vsel %vm858_vm5, %v853_v40, %v2392_v43  ;;  %v859_v49 = vsel %vm858_vm5, %v851_v38, %v853_v40  ;;  %v2142_v40 = vld [vmem:[%s2590_s1 + $0x80] sm:$0xff]  }
  0xa8   : > { %1911 = vmatmul.mubr.msk.bf16.vlgmr.msra.gmra.mrb[8].mxu1 %vm269_vm3, %v2126_v29  ;;  %1808 = vmatmul.mubr.msk.bf16.gmra.mrb[4].mxu0 %vm269_vm3, %v2387_v39  ;;  %v869_v52 = vsel %vm276_vm1, %v859_v49, 0 }
  0xa9   : > { %422 = vmatpush1.bf16.msra.mxu1 %v413_v41  ;;  %453 = vmatprep.mubr.bf16.mxu1 %v2208_v0  ;;  %v2143_v41 = vld [vmem:[%s2590_s1 + $0x88] sm:$0xff]  }
  0xaa   : > { %2059 = vmatprep.subr.msk.bf16.mxu1 %vm276_vm1, %v2129_v42  ;;  %753 = vmatprep.mubr.bf16.mxu0 %v2208_v0  ;;  %v1007_v45 = vpop.permute.xlu1 %1006  ;;  %v701_v46 = vpop.permute.xlu0 %700 }
  0xab   : > { %1828 = vmatprep.subr.msk.bf16.mxu0 %vm276_vm1, %v860_v44  ;;  %v705_v3 = vsel %vm702_vm4, %v2372_v33, %v701_v46 }
  0xac   : > { %v719_v10 = vsel %vm276_vm1, %v705_v3, 0 }
  0xae   : > { %v2411_v51 = vpop.permute.xlu1 %1010  ;;  %v1009_v53 = vpop.permute.xlu0 %1008 }
  0xaf   : > { %v1016_v55 = vsel %vm1014_vm6, %v1009_v53, %v2411_v51  ;;  %v1015_v62 = vsel %vm1014_vm6, %v1007_v45, %v1009_v53 }
  0xb0   : > { %1796 = vmatmul.mubr.msk.bf16.vlgmr.msra.gmra.mrb[0].mxu1 %vm269_vm3, %v2130_v47  ;;  %1818 = vmatmul.mubr.msk.bf16.vlgmr.msra.gmra.mrb[0].mxu0 %vm269_vm3, %v2131_v48  ;;  %v1025_v2 = vsel %vm276_vm1, %v1015_v62, 0 }
  0xb1   : > { %1915 = vmatpush3.bf16.msra.mxu1 %v419_v50  ;;  %463 = vmatprep.mubr.bf16.mxu1 %v2208_v0 }
  0xb2   : > { %2060 = vmatprep.subr.msk.bf16.mxu1 %vm276_vm1, %v549_v54  ;;  %763 = vmatprep.mubr.bf16.mxu0 %v2208_v0  ;;  %v857_v58 = vpop.permute.xlu0 %856  ;;  %v1163_v59 = vpop.permute.xlu1 %1162 }
  0xb3   : > { %878 = vmatpush1.bf16.msra.mxu0 %v869_v52  ;;  %v861_v14 = vsel %vm858_vm5, %v2392_v43, %v857_v58 }
  0xb4   : > { %1839 = vmatprep.subr.msk.bf16.mxu0 %vm276_vm1, %v1016_v55  ;;  %v875_v21 = vsel %vm276_vm1, %v861_v14, 0 }
  0xb6   : > { %v1165_v61 = vpop.permute.xlu0 %1164  ;;  %v1167_v63 = vpop.permute.xlu1 %1166 }
  0xb7   : > { %v1172_v4 = vsel %vm1170_vm7, %v1165_v61, %v1167_v63  ;;  %v1171_v9 = vsel %vm1170_vm7, %v1163_v59, %v1165_v61 }
  0xb8   : > { %1819 = vmatmul.mubr.msk.bf16.gmra.mrb[4].mxu0 %vm269_vm3, %v2132_v56  ;;  %1797 = vmatmul.mubr.msk.bf16.gmra.mrb[4].mxu1 %vm269_vm3, %v2133_v57  ;;  %v1181_v15 = vsel %vm276_vm1, %v1171_v9, 0 }
  0xb9   : > { %1916 = vmatprep.mubr.msk.bf16.mxu1 %vm269_vm3, %v2130_v47  ;;  %909 = vmatprep.mubr.bf16.mxu0 %v2208_v0 }
  0xba   : > { %v1013_v5 = vpop.permute.xlu0 %1012  ;;  %v1169_v7 = vpop.permute.xlu1 %1168 }
  0xbb   : > { %v1017_v20 = vsel %vm1014_vm6, %v2411_v51, %v1013_v5  ;;  %v1173_v28 = vsel %vm1170_vm7, %v1167_v63, %v1169_v7 }
  0xbc   : > { %v1031_v29 = vsel %vm276_vm1, %v1017_v20, 0  ;;  %v1187_v34 = vsel %vm276_vm1, %v1173_v28, 0 }
  0xbe   : > { %v1319_v8 = vpop.permute.xlu0 %1318  ;;  %v1321_v12 = vpop.permute.xlu1 %1320 }
  0xbf   : > { %v1327_v22 = vsel %vm1326_vm8, %v1319_v8, %v1321_v12 }
  0xc0   : > { %1917 = vmatmul.mubr.msk.bf16.vlgmr.msra.gmra.mrb[8].mxu1 %vm269_vm3, %v2133_v57  ;;  %1829 = vmatmul.mubr.msk.bf16.vlgmr.msra.gmra.mrb[0].mxu0 %vm269_vm3, %v2134_v60  ;;  %v1337_v26 = vsel %vm276_vm1, %v1327_v22, 0 }
  0xc1   : > { %1921 = vmatpush3.bf16.msra.mxu1 %v563_v1  ;;  %919 = vmatprep.mubr.bf16.mxu0 %v2208_v0 }
  0xc2   : > { %2061 = vmatprep.subr.msk.bf16.mxu1 %vm276_vm1, %v705_v3  ;;  %1922 = vmatprep.mubr.msk.bf16.mxu1 %vm269_vm3, %v2367_v30  ;;  %v1323_v13 = vpop.permute.xlu0 %1322  ;;  %v1325_v18 = vpop.permute.xlu1 %1324  ;;  %v2139_v30 = vld [vmem:[%s2590_s1 + $0x68] sm:$0xff]  }
  0xc3   : > { %1034 = vmatpush1.bf16.msra.mxu0 %v1025_v2  ;;  %v1328_v16 = vsel %vm1326_vm8, %v1321_v12, %v1323_v13  ;;  %v1329_v33 = vsel %vm1326_vm8, %v1323_v13, %v1325_v18 }
  0xc4   : > { %1850 = vmatprep.subr.msk.bf16.mxu0 %vm276_vm1, %v1172_v4  ;;  %v1343_v38 = vsel %vm276_vm1, %v1329_v33, 0 }
  0xc6   : > { %v1475_v19 = vpop.permute.xlu0 %1474  ;;  %v1477_v24 = vpop.permute.xlu1 %1476 }
  0xc7   : > { %v1483_v32 = vsel %vm1482_vm9, %v1475_v19, %v1477_v24 }
  0xc8   : > { %1830 = vmatmul.mubr.msk.bf16.gmra.mrb[4].mxu0 %vm269_vm3, %v2135_v6  ;;  %v1493_v35 = vsel %vm276_vm1, %v1483_v32, 0 }
  0xc9   : > { %1065 = vmatprep.mubr.bf16.mxu0 %v2208_v0 }
  0xca   : > { %v1479_v25 = vpop.permute.xlu0 %1478  ;;  %v1481_v37 = vpop.permute.xlu1 %1480 }
  0xcb   : > { %v1484_v27 = vsel %vm1482_vm9, %v1477_v24, %v1479_v25 }
  0xcc   : > { %1923 = vmatmul.mubr.msk.bf16.vlgmr.msra.gmra.mrb[8].mxu1 %vm269_vm3, %v2387_v39  ;;  %v1485_v39 = vsel %vm1482_vm9, %v1479_v25, %v1481_v37 }
  0xcd   : > { %1927 = vmatpush3.bf16.msra.mxu1 %v719_v10  ;;  %1928 = vmatprep.mubr.msk.bf16.mxu1 %vm269_vm3, %v2131_v48  ;;  %v1499_v42 = vsel %vm276_vm1, %v1485_v39, 0 }
  0xce   : > { %2062 = vmatprep.subr.msk.bf16.mxu1 %vm276_vm1, %v861_v14 }
  0xd0   : > { %1840 = vmatmul.mubr.msk.bf16.vlgmr.msra.gmra.mrb[0].mxu0 %vm269_vm3, %v2136_v11 }
  0xd1   : > { %1075 = vmatprep.mubr.bf16.mxu0 %v2208_v0  ;;  %1190 = vmatpush1.bf16.msra.mxu0 %v1181_v15 }
  0xd2   : > { %1861 = vmatprep.subr.msk.bf16.mxu0 %vm276_vm1, %v1328_v16 }
  0xd8   : > { %1929 = vmatmul.mubr.msk.bf16.vlgmr.msra.gmra.mrb[8].mxu1 %vm269_vm3, %v2132_v56  ;;  %1841 = vmatmul.mubr.msk.bf16.gmra.mrb[4].mxu0 %vm269_vm3, %v2137_v17 }
  0xd9   : > { %1933 = vmatpush3.bf16.msra.mxu1 %v875_v21  ;;  %1221 = vmatprep.mubr.bf16.mxu0 %v2208_v0 }
  0xda   : > { %2063 = vmatprep.subr.msk.bf16.mxu1 %vm276_vm1, %v1017_v20  ;;  %1934 = vmatprep.mubr.msk.bf16.mxu1 %vm269_vm3, %v2134_v60 }
  0xdb   : > { %v1625_v50 = vpop.permute.xlu1 %1624  ;;  %v1620_v52 = vpop.permute.xlu0 %1619 }
  0xdf   : > { %v1638_v62 = vpop.permute.xlu1 %1637  ;;  %v1643_v2 = vpop.permute.xlu0 %1642 }
  0xe0   : > { %1851 = vmatmul.mubr.msk.bf16.vlgmr.msra.gmra.mrb[0].mxu0 %vm269_vm3, %v2138_v23 }
  0xe1   : > { %1231 = vmatprep.mubr.bf16.mxu0 %v2208_v0  ;;  %1346 = vmatpush1.bf16.msra.mxu0 %v1337_v26 }
  0xe2   : > { %1872 = vmatprep.subr.msk.bf16.mxu0 %vm276_vm1, %v1484_v27 }
  0xe3   : > { %v1667_v13 = vpop.permute.xlu0 %1666 }
  0xe4   : > { %1935 = vmatmul.mubr.msk.bf16.vlgmr.msra.gmra.mrb[8].mxu1 %vm269_vm3, %v2135_v6  ;;  %v1662_v6 = vpop.permute.xlu1 %1661 }
  0xe5   : > { %1939 = vmatpush3.bf16.msra.mxu1 %v1031_v29  ;;  %1940 = vmatprep.mubr.msk.bf16.mxu1 %vm269_vm3, %v2136_v11 }
  0xe6   : > { %2064 = vmatprep.subr.msk.bf16.mxu1 %vm276_vm1, %v1173_v28 }
  0xe8   : > { %1852 = vmatmul.mubr.msk.bf16.gmra.mrb[4].mxu0 %vm269_vm3, %v2139_v30 }
  0xe9   : > { %1377 = vmatprep.mubr.bf16.mxu0 %v2208_v0 }
  0xf0   : > { %1941 = vmatmul.mubr.msk.bf16.vlgmr.msra.gmra.mrb[8].mxu1 %vm269_vm3, %v2137_v17  ;;  %1862 = vmatmul.mubr.msk.bf16.vlgmr.msra.gmra.mrb[0].mxu0 %vm269_vm3, %v2140_v31 }
  0xf1   : > { %1945 = vmatpush3.bf16.msra.mxu1 %v1187_v34  ;;  %1387 = vmatprep.mubr.bf16.mxu0 %v2208_v0 }
  0xf2   : > { %2065 = vmatprep.subr.msk.bf16.mxu1 %vm276_vm1, %v1329_v33  ;;  %1946 = vmatprep.mubr.msk.bf16.mxu1 %vm269_vm3, %v2138_v23 }
  0xf3   : > { %1502 = vmatpush1.bf16.msra.mxu0 %v1493_v35 }
  0xf8   : > { %1863 = vmatmul.mubr.msk.bf16.gmra.mrb[4].mxu0 %vm269_vm3, %v2141_v36 }
  0xf9   : > { %1533 = vmatprep.mubr.bf16.mxu0 %v2208_v0 }
  0xfc   : > { %1947 = vmatmul.mubr.msk.bf16.vlgmr.msra.gmra.mrb[8].mxu1 %vm269_vm3, %v2139_v30 }
  0xfd   : > { %1951 = vmatpush3.bf16.msra.mxu1 %v1343_v38  ;;  %1952 = vmatprep.mubr.msk.bf16.mxu1 %vm269_vm3, %v2140_v31 }
  0xfe   : > { %2066 = vmatprep.subr.msk.bf16.mxu1 %vm276_vm1, %v1485_v39 }
 0x100   : > { %1873 = vmatmul.mubr.msk.bf16.vlgmr.msra.gmra.mrb[0].mxu0 %vm269_vm3, %v2142_v40 }
 0x101   : > { %1543 = vmatprep.mubr.bf16.mxu0 %v2208_v0 }
 0x108   : > { %1953 = vmatmul.mubr.msk.bf16.vlgmr.msra.gmra.mrb[8].mxu1 %vm269_vm3, %v2141_v36  ;;  %1874 = vmatmul.mubr.msk.bf16.gmra.mrb[4].mxu0 %vm269_vm3, %v2143_v41 }
 0x109   : > { %1957 = vmatpush3.bf16.msra.mxu1 %v1499_v42  ;;  %1958 = vmatprep.mubr.msk.bf16.mxu1 %vm269_vm3, %v2142_v40 }
 0x114   : > { %1959 = vmatmul.mubr.msk.bf16.vlgmr.msra.gmra.mrb[8].mxu1 %vm269_vm3, %v2143_v41 }
 0x183   : > { %v455_v43 = vpop.f32.mrb[0].mxu1 }
 0x184   : > { %v457_v44 = vpop.f32.mrb[1].mxu1 }
 0x185   : > { %v459_v45 = vpop.f32.mrb[2].mxu1 }
 0x186   : > { %v461_v46 = vpop.f32.mrb[3].mxu1 }
 0x18b   : > { %v465_v0 = vpop.f32.mrb[4].mxu1 }
 0x18c   : > { %v467_v47 = vpop.f32.mrb[5].mxu1 }
 0x18d   : > { %v469_v48 = vpop.f32.mrb[6].mxu1 }
 0x18e   : > { %v471_v49 = vpop.f32.mrb[7].mxu1 }
 0x1d3   : > { %v1535_v51 = vpop.f32.mrb[0].mxu0 }
 0x1d4   : > { %v1962_v53 = vadd.f32 %v1535_v51, %v455_v43  ;;  %v1537_v54 = vpop.f32.mrb[1].mxu0 }
 0x1d5   : > { %v1963_v55 = vadd.f32 %v1537_v54, %v457_v44  ;;  %v1539_v56 = vpop.f32.mrb[2].mxu0 }
 0x1d6   : > { %v1964_v57 = vadd.f32 %v1539_v56, %v459_v45  ;;  %v1627_v58 = vmul.f32 %v1962_v53, %v1620_v52  ;;  %v1541_v59 = vpop.f32.mrb[3].mxu0 }
 0x1d7   : > { %v1628_v60 = vmul.f32 %v1963_v55, %v1620_v52  ;;  %v1965_v61 = vadd.f32 %v1541_v59, %v461_v46 }
 0x1d8   : > { %v1630_v63 = vmul.f32 %v1964_v57, %v1625_v50  ;;  %v1645_v3 = vadd.f32 %v1638_v62, %v1627_v58 }
 0x1d9   : > { %v1631_v1 = vmul.f32 %v1965_v61, %v1625_v50  ;;  %v1646_v4 = vadd.f32 %v1638_v62, %v1628_v60 }
 0x1da   : > { %v1648_v7 = vadd.f32 %v1643_v2, %v1630_v63  ;;  %v1651_v14 = vmax.f32 %v1645_v3, 0.0 }
 0x1db   : > { %v1545_v5 = vpop.f32.mrb[4].mxu0  ;;  %v1649_v10 = vadd.f32 %v1643_v2, %v1631_v1  ;;  %v1652_v18 = vmax.f32 %v1646_v4, 0.0 }
 0x1dc   : > { %v1966_v8 = vadd.f32 %v1545_v5, %v465_v0  ;;  %v1547_v9 = vpop.f32.mrb[5].mxu0  ;;  %v1654_v21 = vmax.f32 %v1648_v7, 0.0 }
 0x1dd   : > { %v1967_v11 = vadd.f32 %v1547_v9, %v467_v47  ;;  %v1549_v12 = vpop.f32.mrb[6].mxu0  ;;  %v1655_v24 = vmax.f32 %v1649_v10, 0.0 }
 0x1de   : > { %v1669_v15 = vadd.f32 %v1966_v8, %v1662_v6  ;;  %v1968_v16 = vadd.f32 %v1549_v12, %v469_v48  ;;  %v1551_v17 = vpop.f32.mrb[7].mxu0 }
 0x1df   : > { %v1670_v19 = vadd.f32 %v1967_v11, %v1662_v6  ;;  %v1969_v20 = vadd.f32 %v1551_v17, %v471_v49 }
 0x1e0   : > { %v1675_v22 = vadd.f32 %v1669_v15, %v1651_v14  ;;  %v1672_v23 = vadd.f32 %v1968_v16, %v1667_v13 }
 0x1e1   : > { %v1676_v25 = vadd.f32 %v1670_v19, %v1652_v18  ;;  %v1673_v26 = vadd.f32 %v1969_v20, %v1667_v13 }
 0x1e2   : > { %v1681_v27 = vmax.f32 %v1675_v22, 0.0  ;;  %v1678_v28 = vadd.f32 %v1672_v23, %v1654_v21 }
 0x1e3   : > { %v1682_v29 = vmax.f32 %v1676_v25, 0.0  ;;  %v1679_v30 = vadd.f32 %v1673_v26, %v1655_v24 }
 0x1e4   : > { %1687 = vst [vmem:[%s217_s30] sm:$0xff] %v1681_v27  ;;  %v1684_v31 = vmax.f32 %v1678_v28, 0.0 }
 0x1e5   : > { %1688 = vst [vmem:[%s217_s30 + $0x8] sm:$0xff] %v1682_v29  ;;  %v1685_v32 = vmax.f32 %v1679_v30, 0.0 }
 0x1e6   : > { %1690 = vst [vmem:[%s217_s30 + $0x18] sm:$0xff] %v1684_v31 }
 0x1e7   : > { %1691 = vst [vmem:[%s217_s30 + $0x20] sm:$0xff] %v1685_v32  ;;  %v1960_v33 = vpop.f32.mrb[8].mxu1 }
 0x1e8   : > { %v1588_v34 = vpop.f32.mrb[9].mxu1  ;;  %v1671_v40 = vadd.f32 %v1960_v33, %v1662_v6 }
 0x1e9   : > { %v1629_v35 = vmul.f32 %v1620_v52, %v1588_v34  ;;  %v1961_v36 = vpop.f32.mrb[10].mxu1 }
 0x1ea   : > { %v1591_v37 = vpop.f32.mrb[11].mxu1  ;;  %v1674_v44 = vadd.f32 %v1961_v36, %v1667_v13 }
 0x1eb   : > { %v1647_v38 = vadd.f32 %v1638_v62, %v1629_v35  ;;  %v1632_v39 = vmul.f32 %v1625_v50, %v1591_v37 }
 0x1ed   : > { %v1653_v41 = vmax.f32 %v1647_v38, 0.0  ;;  %v1650_v42 = vadd.f32 %v1643_v2, %v1632_v39 }
 0x1ef   : > { %v1677_v43 = vadd.f32 %v1671_v40, %v1653_v41  ;;  %v1656_v45 = vmax.f32 %v1650_v42, 0.0 }
 0x1f1   : > { %v1683_v46 = vmax.f32 %v1677_v43, 0.0  ;;  %v1680_v0 = vadd.f32 %v1674_v44, %v1656_v45 }
 0x1f3   : > { %1689 = vst [vmem:[%s217_s30 + $0x10] sm:$0xff] %v1683_v46  ;;  %v1686_v47 = vmax.f32 %v1680_v0, 0.0 }
 0x1f5   : > { %1692 = vst [vmem:[%s217_s30 + $0x28] sm:$0xff] %v1686_v47 }
 0x1f6   : > { %2157 = shalt.err (!%p2154_p3)
}
 0x1f7   : > { %s2158_s15 = scalar_lea.hbm %s2542_s10, 768  ;;  %s2162_s23 = scalar_lea.hbm %s2594_s5, 1536 }
 0x1f8   : > { %p2159_p4 = scmp.ne.s32.totalorder %s2542_s10, %s2158_s15  ;;  %p2163_p9 = scmp.lt.u32.totalorder %s2542_s10, %s2594_s5 }
 0x1f9   : > { %p2164_p10 = scmp.lt.u32.totalorder %s2162_s23, %s2158_s15  ;;  %p2166_p12 = scmp.lt.u32.totalorder %s2158_s15, %s2542_s10 }
 0x1fa   : > { %p2160_p7 = pnand %p2159_p4, %p2288_p5 }
 0x1fb   : > { %p2165_p11 = por %p2164_p10, %p2163_p9 }
 0x1fc   : > { %p2161_p8 = pneg %p2160_p7 }
 0x1fd   : > { %p2167_p13 = por %p2166_p12, %p2165_p11 }
 0x1ff   : > { %p2168_p0 = pnand %p2167_p13, %p2161_p8 }
 0x201   : > { %2171 = shalt.err (!%p2168_p0)
}
 0x202   : > { %s2218_s30 = smov 384   ;;  %s2219_s6 = smov 24  }
 0x203   : > { %2069 = dma.vmem_to_hbm [thread:$0]  (%p2288_p5), %s2544_s9, 768, %s2542_s10, %s2548_s22, %s2218_s30, %s2218_s30, %s2219_s6  }
 0x204 PF: > { %p2075_p1 = scmp.ge.s32.totalorder %s2206_s21, 2  ;;  %s1722_s7 = sand.u32 1, %s2194_s18  }
 0x205   : > { %s1723_s8 = scalar_lea.sflag [#allocation3], %s1722_s7 }
 0x206   : > { %p2072_p2 = pnand %p2075_p1, %p2292_p6 }
 0x208   : > { %2189 = dma.done.wait (!%p2072_p2), %s1723_s8, 768  }
 0x209   : > { %2191 = vsyncadd (!%p2072_p2), %s1723_s8, 4294966528  ;;  %p15_p3 = scmp.ge.s32.totalorder %s2275_s24, 4   ;;  %s2597_s18 = smov %s2198_s19 }
 0x20a   : > { %s2598_s19 = smov %s2202_s20  ;;  %s2599_s20 = smov %s2286_s27 }
 0x20b   : > { %s2600_s21 = smov %s2275_s24  ;;  %17 = sbr.rel (!%p15_p3) target bundleno = 3 (0x3), region = 83 }
 0x212   :  { %1728 = vsyncpa [#allocation3], 1 }
 0x213   :  { %1730 = vsyncpa [#allocation3 + $0x1], 1 }

</bundles_post_ra>
